<compile_context>
chip_gen: v7x
topology: tpu7x:2x2x1
jax: 0.10.0
libtpu: 0.0.40
codegen_flags: <defaults>
</compile_context>

<pallas_src>
import jax
import jax.numpy as jnp
from jax.experimental import pallas as pl
from jax.experimental.pallas import tpu as pltpu


def _mil_kernel_verbose(pool_ref, x_ref, w1_ref, b1_ref, w2_ref, b2_ref,
                        inst_ref, bag_ref):
    """MIL forward for BT bags flattened to (BT*N, D) rows.

    pool_ref: (BT, BT*N)  block-diagonal 1/N pooling matrix (bag mean on MXU)
    x_ref:    (BT*N, D)   instances of BT bags
    w1_ref:   (D, H)      encoder weight (x @ W layout)
    b1_ref:   (1, H)      encoder bias
    w2_ref:   (H, C)      classifier weight
    b2_ref:   (1, C)      classifier bias
    inst_ref: (BT*N, C)   per-instance predictions
    bag_ref:  (BT, C)     per-bag predictions (mean over instances)
    """
    x = x_ref[...]
    h = jnp.dot(x, w1_ref[...], preferred_element_type=jnp.float32)
    h = jnp.maximum(h + b1_ref[...], 0.0)
    inst = jnp.dot(h, w2_ref[...], preferred_element_type=jnp.float32)
    inst = inst + b2_ref[...]
    inst_ref[...] = inst.astype(inst_ref.dtype)
    # Segmented per-bag mean as a matmul: rides the idle MXU, avoids XLU
    # cross-sublane reduces, and produces one dense (BT, C) store.
    bag_ref[...] = jnp.dot(pool_ref[...], inst,
                           preferred_element_type=jnp.float32).astype(bag_ref.dtype)


def _mil_kernel_bag_only(pool_ref, x_ref, w1_ref, b1_ref, w2_ref, b2_ref,
                         bag_ref):
    """Non-verbose path: instance predictions stay in VMEM, no HBM writeback."""
    x = x_ref[...]
    h = jnp.dot(x, w1_ref[...], preferred_element_type=jnp.float32)
    h = jnp.maximum(h + b1_ref[...], 0.0)
    inst = jnp.dot(h, w2_ref[...], preferred_element_type=jnp.float32)
    inst = inst + b2_ref[...]
    bag_ref[...] = jnp.dot(pool_ref[...], inst,
                           preferred_element_type=jnp.float32).astype(bag_ref.dtype)


def _choose_bags_per_step(B, N, D, C, verbose,
                          target_rows=256, vmem_budget_bytes=8 << 20):
    """Pick BT (bags per grid step): divisor of B, sublane-aligned, VMEM-safe."""

    def step_bytes(bt):
        rows = bt * N
        nbytes = 2 * rows * D * 4          # input tile, double-buffered
        nbytes += 2 * bt * C * 4           # bag output, double-buffered
        if verbose:
            nbytes += 2 * rows * C * 4     # instance output, double-buffered
        return nbytes

    best = None
    for bt in range(1, B + 1):
        if B % bt != 0:
            continue
        # (8,128) rule: when the block does not span the full array, its
        # second-minor dim (bt for bag output, bt*N for input/instances) must
        # be a multiple of 8.  bt % 8 == 0 covers both.
        if bt != B and bt % 8 != 0:
            continue
        if best is not None and step_bytes(bt) > vmem_budget_bytes:
            break
        best = bt
        if bt * N >= target_rows:
            break
    return 1 if best is None else best


def mil_forward_pallas(bags, w1, b1, w2, b2, *, verbose=True,
                       bags_per_step=None):
    """Run the MIL forward on TPU via Pallas.

    bags: (B, N, D) float32
    returns: (bag_preds (B, C), instance_preds (B, N, C) or None)
    """
    B, N, D = bags.shape
    H = w1.shape[1]
    C = w2.shape[1]

    bt = (_choose_bags_per_step(B, N, D, C, verbose)
          if bags_per_step is None else bags_per_step)
    assert B % bt == 0, "bags_per_step must divide the number of bags"

    x2d = bags.reshape(B * N, D).astype(jnp.float32)
    b1r = b1.reshape(1, H).astype(jnp.float32)
    b2r = b2.reshape(1, C).astype(jnp.float32)

    # Block-diagonal pooling matrix: bag b averages rows [b*N, (b+1)*N).
    rows = jnp.arange(bt, dtype=jnp.int32)[:, None]
    cols = jnp.arange(bt * N, dtype=jnp.int32)[None, :] // N
    pool = jnp.where(rows == cols, jnp.float32(1.0 / N), jnp.float32(0.0))

    grid = (B // bt,)
    const = lambda i: (0, 0)
    row_blk = lambda i: (i, 0)
    in_specs = [
        pl.BlockSpec((bt, bt * N), const),   # pooling matrix (grid-invariant)
        pl.BlockSpec((bt * N, D), row_blk),  # BT bags, flattened to rows
        pl.BlockSpec((D, H), const),         # encoder W
        pl.BlockSpec((1, H), const),         # encoder b
        pl.BlockSpec((H, C), const),         # classifier W
        pl.BlockSpec((1, C), const),         # classifier b
    ]
    bag_spec = pl.BlockSpec((bt, C), row_blk)
    compiler_params = pltpu.CompilerParams(dimension_semantics=("parallel",))

    if verbose:
        out_shapes = (
            jax.ShapeDtypeStruct((B * N, C), jnp.float32),  # instance preds
            jax.ShapeDtypeStruct((B, C), jnp.float32),      # bag preds
        )
        out_specs = [pl.BlockSpec((bt * N, C), row_blk), bag_spec]
        inst2d, bag_preds = pl.pallas_call(
            _mil_kernel_verbose,
            out_shape=out_shapes,
            grid_spec=pltpu.PrefetchScalarGridSpec(
                num_scalar_prefetch=0,
                grid=grid,
                in_specs=in_specs,
                out_specs=out_specs,
            ),
            compiler_params=compiler_params,
        )(pool, x2d, w1, b1r, w2, b2r)
        return bag_preds, inst2d.reshape(B, N, C)

    bag_preds = pl.pallas_call(
        _mil_kernel_bag_only,
        out_shape=jax.ShapeDtypeStruct((B, C), jnp.float32),
        grid_spec=pltpu.PrefetchScalarGridSpec(
            num_scalar_prefetch=0,
            grid=grid,
            in_specs=in_specs,
            out_specs=bag_spec,
        ),
        compiler_params=compiler_params,
    )(pool, x2d, w1, b1r, w2, b2r)
    return bag_preds, None


class MultipleInstanceModelPallas:
    """JAX/Pallas port of MultipleInstanceModel (concrete instance-space MIL)."""

    def __init__(self, n_classes, n_expec_dims, d_in, d_hid, key):
        self.n_classes = n_classes
        self.n_expec_dims = n_expec_dims  # stored, as in the torch base class
        k1, k2, k3, k4 = jax.random.split(key, 4)
        # Deterministic param init (uniform fan-in scaling, like nn.Linear).
        s1 = 1.0 / jnp.sqrt(d_in)
        s2 = 1.0 / jnp.sqrt(d_hid)
        self.w1 = jax.random.uniform(k1, (d_in, d_hid), jnp.float32, -s1, s1)
        self.b1 = jax.random.uniform(k2, (d_hid,), jnp.float32, -s1, s1)
        self.w2 = jax.random.uniform(k3, (d_hid, n_classes), jnp.float32, -s2, s2)
        self.b2 = jax.random.uniform(k4, (n_classes,), jnp.float32, -s2, s2)

    def _internal_forward(self, bags, verbose=True):
        return mil_forward_pallas(bags, self.w1, self.b1, self.w2, self.b2,
                                  verbose=verbose)

    def forward(self, model_input):
        # Non-verbose kernel: no (B, N, C) instance writeback to HBM.
        bag_preds, _ = self._internal_forward(model_input, verbose=False)
        return bag_preds

    def forward_verbose(self, model_input):
        return self._internal_forward(model_input, verbose=True)

    def suggest_train_params(self):
        return {}

    def get_param_save_string(self):
        return ''


def _reference_forward(bags, w1, b1, w2, b2):
    h = jnp.maximum(jnp.einsum('bnd,dh->bnh', bags, w1) + b1, 0.0)
    inst = jnp.einsum('bnh,hc->bnc', h, w2) + b2
    return inst.mean(axis=1), inst


if __name__ == "__main__":
    key = jax.random.PRNGKey(0)
    k_model, k_data = jax.random.split(key)

    # Small shapes: 2 bags, 8 instances per bag, 32 features, hidden 64, 4 classes.
    B, N, D, H, C = 2, 8, 32, 64, 4
    n_expec_dims = 1

    model = MultipleInstanceModelPallas(
        n_classes=C, n_expec_dims=n_expec_dims, d_in=D, d_hid=H, key=k_model
    )

    bags = jax.random.normal(k_data, (B, N, D), dtype=jnp.float32)

    # Verbose path (bag + instance predictions).
    bag_preds, inst_preds = model.forward_verbose(bags)
    bag_preds = jax.block_until_ready(bag_preds)
    inst_preds = jax.block_until_ready(inst_preds)

    # Non-verbose path (bag predictions only, no instance HBM writeback).
    bag_only = jax.block_until_ready(model.forward(bags))

    # Correctness check against a pure-JAX reference.
    ref_bag, ref_inst = _reference_forward(
        bags, model.w1, model.b1, model.w2, model.b2
    )
    assert bag_preds.shape == (B, C)
    assert inst_preds.shape == (B, N, C)
    assert bag_only.shape == (B, C)
    assert jnp.allclose(bag_preds, ref_bag, atol=1e-4, rtol=1e-4)
    assert jnp.allclose(inst_preds, ref_inst, atol=1e-4, rtol=1e-4)
    assert jnp.allclose(bag_only, ref_bag, atol=1e-4, rtol=1e-4)

    print("KERNEL_OK")
</pallas_src>

<mosaic_0001>
module attributes {stable_mosaic.version = 11 : i64} {
  func.func @_mil_kernel_verbose(%arg0: i32, %arg1: memref<2x16xf32, #tpu.memory_space<vmem>>, %arg2: memref<16x32xf32, #tpu.memory_space<vmem>>, %arg3: memref<32x64xf32, #tpu.memory_space<vmem>>, %arg4: memref<1x64xf32, #tpu.memory_space<vmem>>, %arg5: memref<64x4xf32, #tpu.memory_space<vmem>>, %arg6: memref<1x4xf32, #tpu.memory_space<vmem>>, %arg7: memref<16x4xf32, #tpu.memory_space<vmem>>, %arg8: memref<2x4xf32, #tpu.memory_space<vmem>>) attributes {dimension_semantics = [#tpu.dimension_semantics<parallel>], iteration_bounds = array<i64: 1>, scalar_prefetch = 0 : i64, scratch_operands = 0 : i64, tpu.core_type = #tpu.core_type<tc>, window_params = [{pipeline_mode = #tpu.pipeline_mode<synchronous>, transform_indices = @transform_0, window_bounds = array<i64: 2, 16>}, {transform_indices = @transform_1, window_bounds = array<i64: 16, 32>}, {pipeline_mode = #tpu.pipeline_mode<synchronous>, transform_indices = @transform_2, window_bounds = array<i64: 32, 64>}, {pipeline_mode = #tpu.pipeline_mode<synchronous>, transform_indices = @transform_3, window_bounds = array<i64: 1, 64>}, {pipeline_mode = #tpu.pipeline_mode<synchronous>, transform_indices = @transform_4, window_bounds = array<i64: 64, 4>}, {pipeline_mode = #tpu.pipeline_mode<synchronous>, transform_indices = @transform_5, window_bounds = array<i64: 1, 4>}, {transform_indices = @transform_6, window_bounds = array<i64: 16, 4>}, {transform_indices = @transform_7, window_bounds = array<i64: 2, 4>}]} {
    %c0 = arith.constant 0 : index
    %c0_0 = arith.constant 0 : index
    %0 = vector.load %arg2[%c0, %c0_0] : memref<16x32xf32, #tpu.memory_space<vmem>>, vector<16x32xf32>
    %c0_1 = arith.constant 0 : index
    %c0_2 = arith.constant 0 : index
    %1 = vector.load %arg3[%c0_1, %c0_2] : memref<32x64xf32, #tpu.memory_space<vmem>>, vector<32x64xf32>
    %cst = arith.constant dense<0.000000e+00> : vector<16x64xf32>
    %2 = tpu.matmul %0, %1, %cst {dimension_numbers = #tpu.dot_dimension_numbers<[1], [0], [0], [1], [0, 0, 1, 1], [], []>} : vector<16x32xf32>, vector<32x64xf32>, vector<16x64xf32> -> vector<16x64xf32>
    %c0_3 = arith.constant 0 : index
    %c0_4 = arith.constant 0 : index
    %3 = vector.load %arg4[%c0_3, %c0_4] : memref<1x64xf32, #tpu.memory_space<vmem>>, vector<1x64xf32>
    %4 = vector.broadcast %3 : vector<1x64xf32> to vector<16x64xf32>
    %5 = arith.addf %2, %4 : vector<16x64xf32>
    %cst_5 = arith.constant 0.000000e+00 : f32
    %6 = vector.broadcast %cst_5 : f32 to vector<16x64xf32>
    %7 = arith.maximumf %5, %6 : vector<16x64xf32>
    %c0_6 = arith.constant 0 : index
    %c0_7 = arith.constant 0 : index
    %8 = vector.load %arg5[%c0_6, %c0_7] : memref<64x4xf32, #tpu.memory_space<vmem>>, vector<64x4xf32>
    %cst_8 = arith.constant dense<0.000000e+00> : vector<16x4xf32>
    %9 = tpu.matmul %7, %8, %cst_8 {dimension_numbers = #tpu.dot_dimension_numbers<[1], [0], [0], [1], [0, 0, 1, 1], [], []>} : vector<16x64xf32>, vector<64x4xf32>, vector<16x4xf32> -> vector<16x4xf32>
    %c0_9 = arith.constant 0 : index
    %c0_10 = arith.constant 0 : index
    %10 = vector.load %arg6[%c0_9, %c0_10] : memref<1x4xf32, #tpu.memory_space<vmem>>, vector<1x4xf32>
    %11 = vector.broadcast %10 : vector<1x4xf32> to vector<16x4xf32>
    %12 = arith.addf %9, %11 : vector<16x4xf32>
    %c0_11 = arith.constant 0 : index
    %c0_12 = arith.constant 0 : index
    %13 = vector.load %arg7[%c0_11, %c0_12] : memref<16x4xf32, #tpu.memory_space<vmem>>, vector<16x4xf32>
    tpu.vector_store %arg7[%c0_11, %c0_12], %12 {strides = array<i32>} : memref<16x4xf32, #tpu.memory_space<vmem>>, vector<16x4xf32>,
    %c0_13 = arith.constant 0 : index
    %c0_14 = arith.constant 0 : index
    %14 = vector.load %arg1[%c0_13, %c0_14] : memref<2x16xf32, #tpu.memory_space<vmem>>, vector<2x16xf32>
    %cst_15 = arith.constant dense<0.000000e+00> : vector<2x4xf32>
    %15 = tpu.matmul %14, %12, %cst_15 {dimension_numbers = #tpu.dot_dimension_numbers<[1], [0], [0], [1], [0, 0, 1, 1], [], []>} : vector<2x16xf32>, vector<16x4xf32>, vector<2x4xf32> -> vector<2x4xf32>
    %c0_16 = arith.constant 0 : index
    %c0_17 = arith.constant 0 : index
    %16 = vector.load %arg8[%c0_16, %c0_17] : memref<2x4xf32, #tpu.memory_space<vmem>>, vector<2x4xf32>
    tpu.vector_store %arg8[%c0_16, %c0_17], %15 {strides = array<i32>} : memref<2x4xf32, #tpu.memory_space<vmem>>, vector<2x4xf32>,
    return
  }
  func.func @transform_0(%arg0: i32) -> (i32, i32) {
    %c0_i32 = arith.constant 0 : i32
    %c0_i32_0 = arith.constant 0 : i32
    %c0_i32_1 = arith.constant 0 : i32
    return %c0_i32, %c0_i32_0 : i32, i32
  }
  func.func @transform_1(%arg0: i32) -> (i32, i32) {
    %c0_i32 = arith.constant 0 : i32
    %c0_i32_0 = arith.constant 0 : i32
    return %arg0, %c0_i32 : i32, i32
  }
  func.func @transform_2(%arg0: i32) -> (i32, i32) {
    %c0_i32 = arith.constant 0 : i32
    %c0_i32_0 = arith.constant 0 : i32
    %c0_i32_1 = arith.constant 0 : i32
    return %c0_i32, %c0_i32_0 : i32, i32
  }
  func.func @transform_3(%arg0: i32) -> (i32, i32) {
    %c0_i32 = arith.constant 0 : i32
    %c0_i32_0 = arith.constant 0 : i32
    %c0_i32_1 = arith.constant 0 : i32
    return %c0_i32, %c0_i32_0 : i32, i32
  }
  func.func @transform_4(%arg0: i32) -> (i32, i32) {
    %c0_i32 = arith.constant 0 : i32
    %c0_i32_0 = arith.constant 0 : i32
    %c0_i32_1 = arith.constant 0 : i32
    return %c0_i32, %c0_i32_0 : i32, i32
  }
  func.func @transform_5(%arg0: i32) -> (i32, i32) {
    %c0_i32 = arith.constant 0 : i32
    %c0_i32_0 = arith.constant 0 : i32
    %c0_i32_1 = arith.constant 0 : i32
    return %c0_i32, %c0_i32_0 : i32, i32
  }
  func.func @transform_6(%arg0: i32) -> (i32, i32) {
    %c0_i32 = arith.constant 0 : i32
    %c0_i32_0 = arith.constant 0 : i32
    return %arg0, %c0_i32 : i32, i32
  }
  func.func @transform_7(%arg0: i32) -> (i32, i32) {
    %c0_i32 = arith.constant 0 : i32
    %c0_i32_0 = arith.constant 0 : i32
    return %arg0, %c0_i32 : i32, i32
  }
}

</mosaic_0001>

<bundles_post_ra>
// kernel: tpu_custom_call.1
= control target key start
LH: loop header
LB: loop body
LE: loop exit
PB: predicated region body
PF: predicated region fallthrough
CT: control target
= control target key end

     0   :  { %vm39_vm0 = vcmask 261120   ;;  %s551_s0 = inlined_call_operand.vmem [shape: f32[2,16], index: 0, kind: input, shape index: {}]   ;;  %s552_s1 = inlined_call_operand.vmem [shape: f32[16,32], index: 1, kind: input, shape index: {}]   ;;  %s553_s2 = inlined_call_operand.vmem [shape: f32[32,64], index: 2, kind: input, shape index: {}]   ;;  %s554_s3 = inlined_call_operand.vmem [shape: f32[1,64], index: 3, kind: input, shape index: {}]   ;;  %s555_s4 = inlined_call_operand.vmem [shape: f32[64,4], index: 4, kind: input, shape index: {}]   ;;  %s556_s5 = inlined_call_operand.vmem [shape: f32[1,4], index: 5, kind: input, shape index: {}]   ;;  %s557_s6 = inlined_call_operand.vmem [shape: f32[16,4], index: 6, kind: output, shape index: {0}]   ;;  %s558_s7 = inlined_call_operand.hbm [shape: f32[2,4], index: 7, kind: output, shape index: {1}]  }
   0x1   :  { %v28_v0 = vld [vmem:[%s553_s2] sm:$0xff]  ;;  %v29_v1 = vld [vmem:[%s553_s2 + $0x8] sm:$0xff]  ;;  %v30_v2 = vld [vmem:[%s553_s2 + $0x10] sm:$0xff] }
   0x2   :  { %v381_v3 = vpack.c.bf16 %v29_v1, %v28_v0  ;;  %v31_v4 = vld [vmem:[%s553_s2 + $0x18] sm:$0xff]  ;;  %v26_v5 = vld [vmem:[%s552_s1] sm:$0xff]  ;;  %v124_v8 = vld [vmem:[%s555_s4 + $0x8] sm:$0xff] }
   0x3   :  { %v385_v6 = vpack.c.bf16 %v31_v4, %v30_v2  ;;  %352 = vmatprep.mubr.msk.f32.mxu0 %vm39_vm0, %v26_v5  ;;  %v123_v7 = vld [vmem:[%s555_s4] sm:$0xff]  ;;  %v125_v9 = vld [vmem:[%s555_s4 + $0x10] sm:$0xff]  ;;  %v126_v11 = vld [vmem:[%s555_s4 + $0x18] sm:$0xff] }
   0x4   :  { %382 = vmatprep.subr.bf16.mxu0 %v381_v3  ;;  %v389_v10 = vpack.c.bf16 %v124_v8, %v123_v7  ;;  %v393_v12 = vpack.c.bf16 %v126_v11, %v125_v9  ;;  %v127_v13 = vld [vmem:[%s555_s4 + $0x20] sm:$0xff]  ;;  %v128_v14 = vld [vmem:[%s555_s4 + $0x28] sm:$0xff] }
   0x5   :  { %384 = vmatpush3.bf16.msra.mxu0 %v381_v3 }
   0x6   :  { %13 = vsyncpa [#allocation3], 0  ;;  %386 = vmatprep.subr.bf16.mxu0 %v385_v6  ;;  %390 = vmatprep.subr.bf16.mxu1 %v389_v10  ;;  %v397_v15 = vpack.c.bf16 %v128_v14, %v127_v13  ;;  %v27_v16 = vld [vmem:[%s552_s1 + $0x8] sm:$0xff]  ;;  %v129_v17 = vld [vmem:[%s555_s4 + $0x30] sm:$0xff]  ;;  %vm138_vm1 = vcmask 523264   ;;  %v436_v27 = vmov 0.0|0.0  }
   0x7   :  { %392 = vmatpush3.bf16.msra.mxu1 %v389_v10  ;;  %v130_v18 = vld [vmem:[%s555_s4 + $0x38] sm:$0xff]  ;;  %v318_v20 = vld [vmem:[%s554_s3] ss:$0 sm:$0xff]  ;;  %vm437_vm2 = vmmov 0   ;;  %v438_v28 = vmov 0.0   ;;  %vm220_vm3 = vcmask 31744  }
   0x8   :  { %394 = vmatprep.subr.bf16.mxu1 %v393_v12  ;;  %v401_v19 = vpack.c.bf16 %v130_v18, %v129_v17  ;;  %v321_v29 = vld [vmem:[%s556_s5] ss:$0 sm:$0xff]  ;;  %vm224_vm4 = vcmask 130048   ;;  %s439_s5 = smov [#allocation2]   ;;  %vm298_vm5 = vcmask 25600  }
   0x9   :  { %388 = vmatpush3.bf16.msra.mxu0 %v385_v6  ;;  %v223_v35 = vld [vmem:[%s551_s0] sm:$0x3]  ;;  %s308_s12 = sshll.u32 %s439_s5, 4  ;;  %s309_s12 = int_to_ptr.vmem [resolvable:$true] %s308_s12 }
   0xa   :  { %405 = vmatprep.subr.bf16.mxu0 %v436_v27  ;;  %s412_s13 = scalar_lea.vmem %s309_s12, 32  ;;  %p417_p1 = scmp.lt.s32.totalorder %s309_s12, %s309_s12 }
   0xb   :  { %396 = vmatpush3.bf16.msra.mxu1 %v393_v12  ;;  %p413_p0 = scmp.ne.s32.totalorder %s309_s12, %s412_s13  ;;  %p418_p2 = scmp.lt.s32.totalorder %s412_s13, %s412_s13 }
   0xc   :  { %353 = vmatmul.mubr.msk.f32.vlgmr.msra.gmra.mrb[0].mxu0 %vm39_vm0, %v27_v16  ;;  %398 = vmatprep.subr.bf16.mxu1 %v397_v15 }
   0xd   :  { %378 = vmatprep.mubr.msk.f32.mxu0 %vm437_vm2, %v438_v28  ;;  %p419_p3 = por %p418_p2, %p417_p1 }
   0xf   :  { %400 = vmatpush3.bf16.msra.mxu1 %v397_v15  ;;  %p420_p4 = pnand %p419_p3, %p413_p0 }
  0x10   :  { %402 = vmatprep.subr.bf16.mxu1 %v401_v19 }
  0x13   :  { %404 = vmatpush3.bf16.msra.mxu1 %v401_v19 }
  0xdf   :  { %v354_v21 = vpop.f32.mrb[0].mxu0 }
  0xe0   :  { %v118_v22 = vadd.f32 %v354_v21, %v318_v20  ;;  %v112_v23 = vpop.f32.mrb[1].mxu0 }
  0xe1   :  { %v113_v24 = vadd.f32 %v318_v20, %v112_v23 }
  0xe2   :  { %v122_v26 = vmax.f32 %v118_v22, 0.0 }
  0xe3   :  { %v121_v25 = vmax.f32 %v113_v24, 0.0 }
  0xe5   :  { %371 = vmatprep.mubr.msk.f32.mxu1 %vm138_vm1, %v121_v25 }
  0xe6   :  { %372 = vmatmul.mubr.msk.f32.vlgmr.msra.gmra.mrb[0].mxu1 %vm138_vm1, %v122_v26 }
 0x1b9   :  { %v373_v30 = vpop.f32.mrb[0].mxu1 }
 0x1ba   :  { %v217_v31 = vadd.f32 %v373_v30, %v321_v29  ;;  %v211_v32 = vpop.f32.mrb[1].mxu1 }
 0x1bb   :  { %v212_v33 = vadd.f32 %v321_v29, %v211_v32 }
 0x1bc   :  { %222 = vst.msk [vmem:[%s557_s6 + $0x8] sm:$0xff] %vm220_vm3, %v217_v31 }
 0x1bd   :  { %221 = vst.msk [vmem:[%s557_s6] sm:$0xff] %vm220_vm3, %v212_v33  ;;  %v406_v34 = vpack.c.bf16 %v217_v31, %v212_v33 }
 0x1bf   :  { %407 = vmatpush3.bf16.msra.mxu0 %v406_v34 }
 0x1c2   :  { %379 = vmatmul.mubr.msk.f32.vlgmr.msra.gmra.mrb[2].mxu0 %vm224_vm4, %v223_v35 }
 0x295   :  { %v294_v36 = vpop.f32.mrb[2].mxu0 }
 0x296   :  { %299 = vst.msk [vmem:[#allocation2] sm:$0x3] %vm298_vm5, %v294_v36  ;;  %v380_v37 = vpop.f32.mrb[3].mxu0 }
 0x297   :  { %423 = shalt.err (!%p420_p4)
}
 0x298   :  { %s424_s0 = scalar_lea.hbm %s558_s7, 32 }
 0x299   :  { %p425_p5 = scmp.ne.s32.totalorder %s558_s7, %s424_s0  ;;  %p428_p6 = scmp.lt.u32.totalorder %s424_s0, %s558_s7 }
 0x29b   :  { %p430_p7 = pnand %p428_p6, %p425_p5 }
 0x29d   :  { %433 = shalt.err (!%p430_p7)
}
 0x29e   :  { %311 = dma.vmem_to_hbm [thread:$0]  %s309_s12, 32, %s558_s7, [#allocation3]  }
 0x29f   :  { %434 = dma.done.wait [#allocation3], 32  }
 0x2a0   :  { %435 = vsyncadd [#allocation3], 4294967264 }
 0x2a1   :  { %317 = vsyncpa [#allocation3], 1 }

</bundles_post_ra>
